<compile_context>
chip_gen: v6e
topology: v6e:2x2x1
jax: 0.10.0
libtpu: 0.0.40
codegen_flags: <defaults>
</compile_context>

<pallas_src>
import math

import jax
import jax.numpy as jnp
from jax import lax
from jax.experimental import pallas as pl
from jax.experimental.pallas import tpu as pltpu

_MIB = 1024 * 1024
_TILE_BUDGET_BYTES = 30 * _MIB   # tiles incl. double-buffering; safe on v7x (64 MiB/TC)
_VMEM_LIMIT_BYTES = 48 * _MIB    # raise v5e/v6e scoped defaults, stay under v7x physical


def _round_up(x, m):
    return ((x + m - 1) // m) * m


def _sublane(dtype):
    # Rows per vreg sublane group: 8 (4-byte), 16 (2-byte), 32 (1-byte) dtypes.
    return max(8, 32 // jnp.dtype(dtype).itemsize)


def _linear_kernel_kres(x_ref, w_ref, b_ref, o_ref):
    # x_ref: (tm, K), w_ref: (tn, K) in PyTorch (out, in) layout, b_ref: (1, tn).
    # Single full-K contraction on the MXU (transposed-RHS dot, no wrapper W^T).
    acc = lax.dot_general(
        x_ref[...], w_ref[...],
        dimension_numbers=(((1,), (1,)), ((), ())),
        preferred_element_type=jnp.float32)
    o_ref[...] = (acc + b_ref[...].astype(jnp.float32)).astype(o_ref.dtype)


def _linear_kernel_ksplit(x_ref, w_ref, b_ref, o_ref, acc_ref):
    # K-split fallback for very large in_features: f32 VMEM accumulator,
    # bias added exactly once on the last K step.
    @pl.when(pl.program_id(2) == 0)
    def _init():
        acc_ref[...] = jnp.zeros_like(acc_ref)

    acc_ref[...] += lax.dot_general(
        x_ref[...], w_ref[...],
        dimension_numbers=(((1,), (1,)), ((), ())),
        preferred_element_type=jnp.float32)

    @pl.when(pl.program_id(2) == pl.num_programs(2) - 1)
    def _finalize():
        o_ref[...] = (acc_ref[...] + b_ref[...].astype(jnp.float32)).astype(o_ref.dtype)


def my_linear(x, weight, bias=None, *, tm=None, tn=None, tk=None, compute_dtype=None):
    """F.linear(x, weight, bias): x (..., K), weight (N, K), bias (N,) -> (..., N)."""
    *lead, K = x.shape
    N, K2 = weight.shape
    assert K == K2, "in_features mismatch"

    out_dtype = x.dtype
    x2d = x.reshape(-1, K)
    M = x2d.shape[0]

    cdt = jnp.dtype(compute_dtype) if compute_dtype is not None else jnp.dtype(x.dtype)
    if x2d.dtype != cdt:
        x2d = x2d.astype(cdt)
    w = weight if weight.dtype == cdt else weight.astype(cdt)
    if bias is None:
        bias = jnp.zeros((N,), out_dtype)
    b2d = bias.reshape(1, N)   # bias stays in its own (typically f32) dtype

    csz = cdt.itemsize
    osz = jnp.dtype(out_dtype).itemsize
    bsz = jnp.dtype(b2d.dtype).itemsize
    sub = _sublane(cdt)

    # ---- tile selection (dtype-aware sublane / 128-lane alignment) -----------
    tm = 512 if tm is None else tm     # multiples of 256 keep v6e/v7x MXU passes full
    tn = 512 if tn is None else tn
    tm = M if M <= tm else max(sub, (tm // sub) * sub)
    tn = N if N <= tn else max(128, (tn // 128) * 128)
    m_grid = pl.cdiv(M, tm)
    n_grid = pl.cdiv(N, tn)

    # VMEM working set of the K-resident schedule (double-buffered in/out tiles).
    def _kres_bytes(k_blk):
        return 2 * (tm * k_blk + tn * k_blk) * csz + 2 * tn * bsz + 2 * tm * tn * osz

    k_resident = (tk is None or tk >= K) and _kres_bytes(K) <= _TILE_BUDGET_BYTES

    if k_resident:
        # Order the grid so the operand indexed by the OUTER axis keeps the same
        # block index across the inner sweep -> Pallas skips its re-DMA, so it is
        # read from HBM exactly once.  Pick the order with less total HBM traffic.
        w_res_bytes = N * K + M * K * n_grid   # outer = N tiles (W resident)
        x_res_bytes = M * K + N * K * m_grid   # outer = M tiles (x resident)
        if w_res_bytes <= x_res_bytes:
            grid = (n_grid, m_grid)            # j outer, i inner: W resident
            x_map = lambda j, i: (i, 0)
            w_map = lambda j, i: (j, 0)
            b_map = lambda j, i: (0, j)
            o_map = lambda j, i: (i, j)
        else:
            grid = (m_grid, n_grid)            # i outer, j inner: x resident
            x_map = lambda i, j: (i, 0)
            w_map = lambda i, j: (j, 0)
            b_map = lambda i, j: (0, j)
            o_map = lambda i, j: (i, j)

        kernel = _linear_kernel_kres
        in_specs = [
            pl.BlockSpec((tm, K), x_map),      # x tile, full K (no padding needed)
            pl.BlockSpec((tn, K), w_map),      # weight tile, PyTorch (out, in) layout
            pl.BlockSpec((1, tn), b_map),      # bias tile
        ]
        out_spec = pl.BlockSpec((tm, tn), o_map)
        scratch = []
        semantics = ("parallel", "parallel")
    else:
        # K-split fallback: 128-aligned K tile sized to the VMEM budget.  The K
        # axis must be zero-padded (OOB reads would feed the reduction).
        if tk is None or tk >= K:
            avail = (_TILE_BUDGET_BYTES - 2 * tm * tn * osz - tm * tn * 4
                     - 2 * tn * bsz)
            tk = (avail // (2 * (tm + tn) * csz)) // 128 * 128
        else:
            tk = (tk // 128) * 128
        tk = max(128, min(tk, _round_up(K, 128)))
        Kp = _round_up(K, tk)
        if Kp != K:
            x2d = jnp.pad(x2d, ((0, 0), (0, Kp - K)))
            w = jnp.pad(w, ((0, 0), (0, Kp - K)))

        grid = (m_grid, n_grid, Kp // tk)
        kernel = _linear_kernel_ksplit
        in_specs = [
            pl.BlockSpec((tm, tk), lambda i, j, k: (i, k)),
            pl.BlockSpec((tn, tk), lambda i, j, k: (j, k)),
            pl.BlockSpec((1, tn), lambda i, j, k: (0, j)),
        ]
        out_spec = pl.BlockSpec((tm, tn), lambda i, j, k: (i, j))
        scratch = [pltpu.VMEM((tm, tn), jnp.float32)]
        semantics = ("parallel", "parallel", "arbitrary")

    cost = pl.CostEstimate(
        flops=2 * M * N * K,
        transcendentals=0,
        bytes_accessed=(M * K + N * K) * csz + N * bsz + M * N * osz)

    out = pl.pallas_call(
        kernel,
        out_shape=jax.ShapeDtypeStruct((M, N), out_dtype),
        grid_spec=pltpu.PrefetchScalarGridSpec(
            num_scalar_prefetch=0,
            grid=grid,
            in_specs=in_specs,
            out_specs=out_spec,
            scratch_shapes=scratch),
        compiler_params=pltpu.CompilerParams(
            dimension_semantics=semantics,
            vmem_limit_bytes=_VMEM_LIMIT_BYTES),
        cost_estimate=cost,
    )(x2d, w, b2d)

    return out.reshape(*lead, N)


def init_my_linear_params(key, in_features, out_features, dtype=jnp.float32):
    """Host-side init mirroring myLinear.reset_parameters:
    weight ~ truncated_normal(mean=0, std=0.1), bias ~ U(-1/sqrt(fan_in), +)."""
    kw, kb = jax.random.split(key)
    w = 0.1 * jax.random.truncated_normal(
        kw, -2.0, 2.0, (out_features, in_features), dtype)
    bound = 1.0 / math.sqrt(in_features)
    b = jax.random.uniform(kb, (out_features,), dtype, -bound, bound)
    return w, b


if __name__ == "__main__":
    key = jax.random.PRNGKey(0)
    keys = jax.random.split(key, 8)

    # --- 1. Module-sized demo: batch=8, in_features=32, out_features=16 ------
    batch, in_features, out_features = 8, 32, 16
    x = jax.random.normal(keys[0], (batch, in_features), jnp.float32)
    weight, bias_ = init_my_linear_params(keys[1], in_features, out_features)

    out = my_linear(x, weight, bias_)
    jax.block_until_ready(out)
    ref = x @ weight.T + bias_
    assert out.shape == (batch, out_features)
    assert jnp.allclose(out, ref, atol=1e-3, rtol=1e-3)

    # F.linear accepts leading batch dims: (..., in_features) -> (..., out_features)
    x3 = x.reshape(2, 4, in_features)
    out3 = my_linear(x3, weight, bias_)
    jax.block_until_ready(out3)
    assert out3.shape == (2, 4, out_features)
    assert jnp.allclose(out3.reshape(batch, out_features), ref, atol=1e-3, rtol=1e-3)

    # --- 2. Multi-tile K-resident path with ragged M/N edges (no padding) ----
    M2, K2, N2 = 48, 384, 160
    x2 = jax.random.normal(keys[2], (M2, K2), jnp.float32)
    w2, b2 = init_my_linear_params(keys[3], K2, N2)
    out2 = my_linear(x2, w2, b2, tm=16, tn=128)          # grid (2, 3), W-resident
    jax.block_until_ready(out2)
    ref2 = x2 @ w2.T + b2
    assert out2.shape == (M2, N2)
    assert jnp.allclose(out2, ref2, atol=1e-3, rtol=1e-3)

    # --- 3. K-split fallback path (K zero-padded to tk multiple, f32 acc) ----
    M3, K3, N3 = 40, 200, 256
    x4 = jax.random.normal(keys[4], (M3, K3), jnp.float32)
    w4, b4 = init_my_linear_params(keys[5], K3, N3)
    out4 = my_linear(x4, w4, b4, tm=16, tn=128, tk=128)  # grid (3, 2, 2)
    jax.block_until_ready(out4)
    ref4 = x4 @ w4.T + b4
    assert out4.shape == (M3, N3)
    assert jnp.allclose(out4, ref4, atol=1e-3, rtol=1e-3)

    # --- 4. bf16 compute path (halves HBM traffic; f32 accumulate + bias) ----
    out5 = my_linear(x2, w2, b2, compute_dtype=jnp.bfloat16)
    jax.block_until_ready(out5)
    assert jnp.allclose(out5, ref2, atol=5e-2, rtol=5e-2)

    print("KERNEL_OK")
</pallas_src>

<mosaic_0001>
module attributes {stable_mosaic.version = 11 : i64} {
  func.func @_linear_kernel_kres(%arg0: i32, %arg1: i32, %arg2: memref<8x32xf32, #tpu.memory_space<vmem>>, %arg3: memref<16x32xf32, #tpu.memory_space<vmem>>, %arg4: memref<1x16xf32, #tpu.memory_space<vmem>>, %arg5: memref<8x16xf32, #tpu.memory_space<vmem>>) attributes {dimension_semantics = [#tpu.dimension_semantics<parallel>, #tpu.dimension_semantics<parallel>], iteration_bounds = array<i64: 1, 1>, scalar_prefetch = 0 : i64, scratch_operands = 0 : i64, tpu.core_type = #tpu.core_type<tc>, window_params = [{transform_indices = @transform_0, window_bounds = array<i64: 8, 32>}, {transform_indices = @transform_1, window_bounds = array<i64: 16, 32>}, {transform_indices = @transform_2, window_bounds = array<i64: 1, 16>}, {transform_indices = @transform_3, window_bounds = array<i64: 8, 16>}]} {
    %c0 = arith.constant 0 : index
    %c0_0 = arith.constant 0 : index
    %0 = vector.load %arg2[%c0, %c0_0] : memref<8x32xf32, #tpu.memory_space<vmem>>, vector<8x32xf32>
    %c0_1 = arith.constant 0 : index
    %c0_2 = arith.constant 0 : index
    %1 = vector.load %arg3[%c0_1, %c0_2] : memref<16x32xf32, #tpu.memory_space<vmem>>, vector<16x32xf32>
    %cst = arith.constant dense<0.000000e+00> : vector<8x16xf32>
    %2 = tpu.matmul %0, %1, %cst {dimension_numbers = #tpu.dot_dimension_numbers<[1], [1], [0], [0], [0, 0, 1, 0], [], []>} : vector<8x32xf32>, vector<16x32xf32>, vector<8x16xf32> -> vector<8x16xf32>
    %c0_3 = arith.constant 0 : index
    %c0_4 = arith.constant 0 : index
    %3 = vector.load %arg4[%c0_3, %c0_4] : memref<1x16xf32, #tpu.memory_space<vmem>>, vector<1x16xf32>
    %4 = vector.broadcast %3 : vector<1x16xf32> to vector<8x16xf32>
    %5 = arith.addf %2, %4 : vector<8x16xf32>
    %c0_5 = arith.constant 0 : index
    %c0_6 = arith.constant 0 : index
    %6 = vector.load %arg5[%c0_5, %c0_6] : memref<8x16xf32, #tpu.memory_space<vmem>>, vector<8x16xf32>
    tpu.vector_store %arg5[%c0_5, %c0_6], %5 {strides = array<i32>} : memref<8x16xf32, #tpu.memory_space<vmem>>, vector<8x16xf32>,
    return
  }
  func.func @transform_0(%arg0: i32, %arg1: i32) -> (i32, i32) {
    %c0_i32 = arith.constant 0 : i32
    %c0_i32_0 = arith.constant 0 : i32
    return %arg1, %c0_i32 : i32, i32
  }
  func.func @transform_1(%arg0: i32, %arg1: i32) -> (i32, i32) {
    %c0_i32 = arith.constant 0 : i32
    %c0_i32_0 = arith.constant 0 : i32
    return %arg0, %c0_i32 : i32, i32
  }
  func.func @transform_2(%arg0: i32, %arg1: i32) -> (i32, i32) {
    %c0_i32 = arith.constant 0 : i32
    %c0_i32_0 = arith.constant 0 : i32
    return %c0_i32, %arg0 : i32, i32
  }
  func.func @transform_3(%arg0: i32, %arg1: i32) -> (i32, i32) {
    %c0_i32 = arith.constant 0 : i32
    return %arg1, %arg0 : i32, i32
  }
}

</mosaic_0001>

<bundles_post_ra>
// kernel: tpu_custom_call.1
= control target key start
LH: loop header
LB: loop body
LE: loop exit
PB: predicated region body
PF: predicated region fallthrough
CT: control target
= control target key end

     0   :  { %8 = vsyncpa [#allocation3], 0  ;;  %s275_s0 = inlined_call_operand.hbm [shape: f32[8,32], index: 0, kind: input, shape index: {}]   ;;  %s276_s1 = inlined_call_operand.hbm [shape: f32[16,32], index: 1, kind: input, shape index: {}]   ;;  %s277_s2 = inlined_call_operand.vmem [shape: f32[1,16], index: 2, kind: input, shape index: {}]   ;;  %s278_s3 = inlined_call_operand.hbm [shape: f32[8,16], index: 3, kind: output, shape index: {}]  }
   0x1   :  { %9 = vsyncpa [#allocation6], 0 }
   0x2   :  { %10 = vsyncpa [#allocation4], 0  ;;  %s236_s12 = smov [#allocation2]   ;;  %s237_s14 = smov [#allocation5]  }
   0x3   :  { %s17_s13 = sshll.u32 %s236_s12, 4  ;;  %s26_s15 = sshll.u32 %s237_s14, 4  ;;  %s18_s13 = int_to_ptr.vmem [resolvable:$true] %s17_s13  ;;  %s27_s15 = int_to_ptr.vmem [resolvable:$true] %s26_s15 }
   0x4   :  { %s178_s16 = scalar_lea.vmem %s18_s13, 128  ;;  %p183_p1 = scmp.lt.s32.totalorder %s18_s13, %s18_s13 }
   0x5   :  { %p179_p0 = scmp.ne.s32.totalorder %s18_s13, %s178_s16  ;;  %p184_p2 = scmp.lt.s32.totalorder %s178_s16, %s178_s16 }
   0x7   :  { %p185_p3 = por %p184_p2, %p183_p1 }
   0x9   :  { %p186_p4 = pnand %p185_p3, %p179_p0 }
   0xb   :  { %189 = shalt.err (!%p186_p4)
}
   0xc   :  { %20 = dma.hbm_to_vmem [thread:$0]  %s275_s0, 128, %s18_s13, [#allocation3]  }
   0xd   :  { %s198_s19 = scalar_lea.vmem %s27_s15, 256  ;;  %p203_p6 = scmp.lt.s32.totalorder %s27_s15, %s27_s15 }
   0xe   :  { %p199_p5 = scmp.ne.s32.totalorder %s27_s15, %s198_s19  ;;  %p204_p7 = scmp.lt.s32.totalorder %s198_s19, %s198_s19 }
  0x10   :  { %p205_p8 = por %p204_p7, %p203_p6 }
  0x12   :  { %p206_p9 = pnand %p205_p8, %p199_p5 }
  0x14   :  { %209 = shalt.err (!%p206_p9)
}
  0x15   :  { %s238_s20 = smov 128   ;;  %s239_s21 = smov 8  }
  0x16   :  { %32 = dma.hbm_to_vmem [thread:$0]  %s276_s1, 256, %s27_s15, [#allocation6], %s238_s20, %s238_s20, %s239_s21  }
  0x17   :  { %230 = dma.done.wait [#allocation3], 128  }
  0x18   :  { %231 = vsyncadd [#allocation3], 4294967168 }
  0x19   :  { %232 = dma.done.wait [#allocation6], 256  }
  0x1a   :  { %233 = vsyncadd [#allocation6], 4294967040  ;;  %v240_v0 = vmov 0.0   ;;  %vm241_vm0 = vmmov 0   ;;  %vm51_vm1 = vcmask 261120   ;;  %v43_v1 = vld [vmem:[#allocation5 + $0x8] sm:$0xff] }
  0x1b   :  { %156 = vmatprep.subr.mxu0 %v240_v0  ;;  %160 = vmatprep.mubr.msk.f32.mxu0 %vm241_vm0, %v240_v0  ;;  %v42_v2 = vld [vmem:[#allocation5] sm:$0xff]  ;;  %v41_v3 = vld [vmem:[#allocation2] sm:$0xff]  ;;  %s242_s1 = smov [#allocation7]   ;;  %vm131_vm2 = vcmask 130048  }
  0x1c   :  { %157 = vmatpush3.xpose.msk.msra.mxu0 %vm51_vm1, %v43_v1  ;;  %v149_v4 = vld [vmem:[%s277_s2] ss:$0 sm:$0xff]  ;;  %s139_s25 = sshll.u32 %s242_s1, 4  ;;  %s140_s25 = int_to_ptr.vmem [resolvable:$true] %s139_s25 }
  0x1d   :  { %158 = vmatprep.subr.mxu0 %v240_v0  ;;  %s210_s26 = scalar_lea.vmem %s140_s25, 128  ;;  %p215_p11 = scmp.lt.s32.totalorder %s140_s25, %s140_s25 }
  0x1e   :  { %p211_p10 = scmp.ne.s32.totalorder %s140_s25, %s210_s26  ;;  %p216_p12 = scmp.lt.s32.totalorder %s210_s26, %s210_s26 }
  0x20   :  { %159 = vmatpush3.xpose.msk.msra.mxu0 %vm51_vm1, %v42_v2  ;;  %p217_p13 = por %p216_p12, %p215_p11 }
  0x22   :  { %p218_p0 = pnand %p217_p13, %p211_p10 }
  0x23   :  { %161 = vmatmul.mubr.msk.f32.vlgmr.msra.gmra.mxu0 %vm51_vm1, %v41_v3 }
  0xe3   :  { %v127_v5 = vpop.f32.mrf.mxu0 }
  0xe4   :  { %v128_v6 = vadd.f32 %v149_v4, %v127_v5 }
  0xe5   :  { %v162_v7 = vpop.f32.mrf.mxu0 }
  0xe6   :  { %132 = vst.msk [vmem:[#allocation7] sm:$0xff] %vm131_vm2, %v128_v6 }
  0xe7   :  { %221 = shalt.err (!%p218_p0)
}
  0xe8   :  { %142 = dma.vmem_to_hbm [thread:$0]  %s140_s25, 128, %s278_s3, [#allocation4]  }
  0xe9   :  { %234 = dma.done.wait [#allocation4], 128  }
  0xea   :  { %235 = vsyncadd [#allocation4], 4294967168 }
  0xeb   :  { %146 = vsyncpa [#allocation3], 1 }
  0xec   :  { %147 = vsyncpa [#allocation6], 1 }
  0xed   :  { %148 = vsyncpa [#allocation4], 1 }

</bundles_post_ra>
